<compile_context>
chip_gen: v5e
topology: v5e:2x2
jax: 0.10.0
libtpu: 0.0.40
codegen_flags: <defaults>
</compile_context>

<pallas_src>
import functools

import jax
import jax.numpy as jnp
from jax.experimental import pallas as pl
from jax.experimental.pallas import tpu as pltpu


def _round_up(n, m):
    return ((n + m - 1) // m) * m


# ----------------------------- fused kernel -----------------------------

def inn_fused_kernel(x_ref,
                     f_w1, f_b1, f_w2, f_b2,
                     ry_w1, ry_b1,
                     r_w2, r_b2, y_w2, y_b2,
                     o_ref, *, clamp, d1, hidden, num_inv):
    """One row-tile through ALL num_inv coupling blocks.

    x_ref : (tm, d1 + d2)  concatenated [x1 | x2]
    o_ref : (tm, d1 + d2)  concatenated [y1 | y2]
    weights are stacked over the leading block axis (num_inv, ...).
    """
    x = x_ref[...].astype(jnp.float32)
    x1 = x[:, :d1]
    x2 = x[:, d1:]

    # Static unroll over the (small) number of invertible blocks.
    for b in range(num_inv):
        # t2 = f(x2);  y1 = x1 + t2
        h = jnp.dot(x2, f_w1[b], preferred_element_type=jnp.float32) + f_b1[b]
        h = jnp.maximum(h, 0.0)
        t2 = jnp.dot(h, f_w2[b], preferred_element_type=jnp.float32) + f_b2[b]
        y1 = x1 + t2

        # r and y both consume y1 -> their first layers are fused into one
        # (d1, 2H) matmul; split the hidden activation afterwards.
        h2 = jnp.dot(y1, ry_w1[b], preferred_element_type=jnp.float32) + ry_b1[b]
        h2 = jnp.maximum(h2, 0.0)
        s1 = (jnp.dot(h2[:, :hidden], r_w2[b],
                      preferred_element_type=jnp.float32) + r_b2[b])
        t1 = (jnp.dot(h2[:, hidden:], y_w2[b],
                      preferred_element_type=jnp.float32) + y_b2[b])

        # e(s1) = exp(clamp * 2 * (sigmoid(s1) - 0.5));  y2 = e(s1)*x2 + t1
        e = jnp.exp(clamp * 2.0 * (jax.nn.sigmoid(s1) - 0.5))
        y2 = e * x2 + t1

        x1, x2 = y1, y2

    o_ref[...] = jnp.concatenate([x1, x2], axis=-1).astype(o_ref.dtype)


# ------------------------------- wrapper --------------------------------

def inn_forward(x, y, blocks, clamp, tm=512):
    """Fused INN forward (rev=False).

    x: (B, T, d_model - d_res), y: (B, T, d_res) -> (y1, y2) same shapes.
    """
    B, T, d1 = x.shape
    d2 = y.shape[-1]
    hidden = blocks[0]["f"]["w1"].shape[1]
    num_inv = len(blocks)
    R = B * T

    # Lane-dense concatenated activation slab: one input / one output stream.
    x12 = jnp.concatenate([x.reshape(R, d1), y.reshape(R, d2)], axis=-1)

    # Row tiling: big tiles, padded to a tile multiple (tail sliced off below).
    tm = min(tm, _round_up(R, 8))
    R_pad = _round_up(R, tm)
    if R_pad != R:
        x12 = jnp.pad(x12, ((0, R_pad - R), (0, 0)))

    # Stack per-role weights across blocks; fuse r/y first-layer weights.
    f_w1 = jnp.stack([p["f"]["w1"] for p in blocks])                  # (nb, d2, H)
    f_b1 = jnp.stack([p["f"]["b1"] for p in blocks])                  # (nb, 1, H)
    f_w2 = jnp.stack([p["f"]["w2"] for p in blocks])                  # (nb, H, d1)
    f_b2 = jnp.stack([p["f"]["b2"] for p in blocks])                  # (nb, 1, d1)
    ry_w1 = jnp.stack([jnp.concatenate([p["r"]["w1"], p["y"]["w1"]], axis=-1)
                       for p in blocks])                              # (nb, d1, 2H)
    ry_b1 = jnp.stack([jnp.concatenate([p["r"]["b1"], p["y"]["b1"]], axis=-1)
                       for p in blocks])                              # (nb, 1, 2H)
    r_w2 = jnp.stack([p["r"]["w2"] for p in blocks])                  # (nb, H, d2)
    r_b2 = jnp.stack([p["r"]["b2"] for p in blocks])                  # (nb, 1, d2)
    y_w2 = jnp.stack([p["y"]["w2"] for p in blocks])                  # (nb, H, d2)
    y_b2 = jnp.stack([p["y"]["b2"] for p in blocks])                  # (nb, 1, d2)
    weights = (f_w1, f_b1, f_w2, f_b2, ry_w1, ry_b1, r_w2, r_b2, y_w2, y_b2)

    d12 = d1 + d2
    grid = (R_pad // tm,)

    in_specs = [pl.BlockSpec((tm, d12), lambda i: (i, 0))]
    for w in weights:
        # Full-array blocks with a constant index_map -> the same (tiny) weight
        # tile is reused on every grid step; activation tiles get the VMEM.
        in_specs.append(pl.BlockSpec(w.shape, lambda i: (0, 0, 0)))

    out_specs = pl.BlockSpec((tm, d12), lambda i: (i, 0))
    out_shape = jax.ShapeDtypeStruct((R_pad, d12), x12.dtype)

    # Explicit VMEM budget (keeps the fused design safe on v7x's 64 MiB/TC).
    weight_bytes = sum(int(w.size) * 4 for w in weights)
    act_bytes = 2 * 2 * tm * d12 * 4                  # double-buffered in + out
    scratch_bytes = 8 * tm * max(2 * hidden, d12) * 4  # intermediate headroom
    vmem_limit = int(max(2 * (weight_bytes + act_bytes + scratch_bytes),
                         16 * 1024 * 1024))
    vmem_limit = min(vmem_limit, 48 * 1024 * 1024)

    # Advisory cost model for the XLA scheduler.
    flops = 6 * hidden * d12 * R_pad * num_inv
    cost = pl.CostEstimate(
        flops=flops,
        transcendentals=2 * R_pad * d2 * num_inv,
        bytes_accessed=4 * (2 * R_pad * d12) + weight_bytes,
    )

    fn = pl.pallas_call(
        functools.partial(inn_fused_kernel, clamp=clamp, d1=d1,
                          hidden=hidden, num_inv=num_inv),
        out_shape=out_shape,
        grid_spec=pltpu.PrefetchScalarGridSpec(
            num_scalar_prefetch=0,
            grid=grid,
            in_specs=in_specs,
            out_specs=out_specs,
        ),
        compiler_params=pltpu.CompilerParams(
            dimension_semantics=("parallel",),
            vmem_limit_bytes=vmem_limit),
        cost_estimate=cost,
    )

    out = fn(x12, *weights)
    out = out[:R]
    return out[:, :d1].reshape(B, T, d1), out[:, d1:].reshape(B, T, d2)


# ---------------- parameter construction (deterministic) ----------------

def _make_mlp_params(key, d_in, d_hidden, d_out):
    k1, k2 = jax.random.split(key)
    return {
        "w1": (jax.random.normal(k1, (d_in, d_hidden), jnp.float32)
               / jnp.sqrt(d_in)).astype(jnp.float32),
        "b1": jnp.zeros((1, d_hidden), jnp.float32),
        "w2": (jax.random.normal(k2, (d_hidden, d_out), jnp.float32)
               / jnp.sqrt(d_hidden)).astype(jnp.float32),
        "b2": jnp.zeros((1, d_out), jnp.float32),
    }


def make_inn_params(key, d_model, d_res, num_inv):
    d1 = d_model - d_res
    d2 = d_res
    hidden = d_model
    blocks = []
    for _ in range(num_inv):
        kr, ky, kf, key = jax.random.split(key, 4)
        blocks.append({
            "r": _make_mlp_params(kr, d1, hidden, d2),   # flag=True
            "y": _make_mlp_params(ky, d1, hidden, d2),   # flag=True
            "f": _make_mlp_params(kf, d2, hidden, d1),   # flag=False
        })
    return blocks


# ---------------- pure-JAX reference for verification ----------------

def _ref_mlp(x, p):
    h = jnp.maximum(x @ p["w1"] + p["b1"], 0.0)
    return h @ p["w2"] + p["b2"]


def _ref_block(x1, x2, params, clamp):
    t2 = _ref_mlp(x2, params["f"])
    y1 = x1 + t2
    s1 = _ref_mlp(y1, params["r"])
    t1 = _ref_mlp(y1, params["y"])
    e = jnp.exp(clamp * 2.0 * (jax.nn.sigmoid(s1) - 0.5))
    y2 = e * x2 + t1
    return y1, y2


def _ref_inn(x, y, blocks, clamp):
    for params in blocks:
        x, y = _ref_block(x, y, params, clamp)
    return x, y


if __name__ == "__main__":
    d_model, d_res = 32, 16
    num_inv = 2
    clamp = 0.2

    key = jax.random.PRNGKey(0)
    kx, ky, kp = jax.random.split(key, 3)
    blocks = make_inn_params(kp, d_model, d_res, num_inv)

    # Small primary case (B=2, T=8).
    B, T = 2, 8
    x = jax.random.normal(kx, (B, T, d_model - d_res), jnp.float32)
    y = jax.random.normal(ky, (B, T, d_res), jnp.float32)

    y1, y2 = inn_forward(x, y, blocks, clamp)
    jax.block_until_ready((y1, y2))
    r1, r2 = _ref_inn(x, y, blocks, clamp)
    assert jnp.allclose(y1, r1, atol=1e-5, rtol=1e-5)
    assert jnp.allclose(y2, r2, atol=1e-5, rtol=1e-5)

    # Larger case exercising row padding + a multi-tile grid
    # (R = 900 -> padded to 1024, two 512-row tiles).
    B2, T2 = 3, 300
    kx2, ky2 = jax.random.split(jax.random.PRNGKey(1))
    xb = jax.random.normal(kx2, (B2, T2, d_model - d_res), jnp.float32)
    yb = jax.random.normal(ky2, (B2, T2, d_res), jnp.float32)
    z1, z2 = inn_forward(xb, yb, blocks, clamp)
    jax.block_until_ready((z1, z2))
    s1, s2 = _ref_inn(xb, yb, blocks, clamp)
    assert jnp.allclose(z1, s1, atol=1e-5, rtol=1e-5)
    assert jnp.allclose(z2, s2, atol=1e-5, rtol=1e-5)

    print("KERNEL_OK")
</pallas_src>

<mosaic_0001>
module attributes {stable_mosaic.version = 11 : i64} {
  func.func @inn_fused_kernel(%arg0: i32, %arg1: memref<16x32xf32, #tpu.memory_space<vmem>>, %arg2: memref<2x16x32xf32, #tpu.memory_space<vmem>>, %arg3: memref<2x1x32xf32, #tpu.memory_space<vmem>>, %arg4: memref<2x32x16xf32, #tpu.memory_space<vmem>>, %arg5: memref<2x1x16xf32, #tpu.memory_space<vmem>>, %arg6: memref<2x16x64xf32, #tpu.memory_space<vmem>>, %arg7: memref<2x1x64xf32, #tpu.memory_space<vmem>>, %arg8: memref<2x32x16xf32, #tpu.memory_space<vmem>>, %arg9: memref<2x1x16xf32, #tpu.memory_space<vmem>>, %arg10: memref<2x32x16xf32, #tpu.memory_space<vmem>>, %arg11: memref<2x1x16xf32, #tpu.memory_space<vmem>>, %arg12: memref<16x32xf32, #tpu.memory_space<vmem>>) attributes {dimension_semantics = [#tpu.dimension_semantics<parallel>], iteration_bounds = array<i64: 1>, scalar_prefetch = 0 : i64, scratch_operands = 0 : i64, tpu.core_type = #tpu.core_type<tc>, window_params = [{transform_indices = @transform_0, window_bounds = array<i64: 16, 32>}, {pipeline_mode = #tpu.pipeline_mode<synchronous>, transform_indices = @transform_1, window_bounds = array<i64: 2, 16, 32>}, {pipeline_mode = #tpu.pipeline_mode<synchronous>, transform_indices = @transform_2, window_bounds = array<i64: 2, 1, 32>}, {pipeline_mode = #tpu.pipeline_mode<synchronous>, transform_indices = @transform_3, window_bounds = array<i64: 2, 32, 16>}, {pipeline_mode = #tpu.pipeline_mode<synchronous>, transform_indices = @transform_4, window_bounds = array<i64: 2, 1, 16>}, {pipeline_mode = #tpu.pipeline_mode<synchronous>, transform_indices = @transform_5, window_bounds = array<i64: 2, 16, 64>}, {pipeline_mode = #tpu.pipeline_mode<synchronous>, transform_indices = @transform_6, window_bounds = array<i64: 2, 1, 64>}, {pipeline_mode = #tpu.pipeline_mode<synchronous>, transform_indices = @transform_7, window_bounds = array<i64: 2, 32, 16>}, {pipeline_mode = #tpu.pipeline_mode<synchronous>, transform_indices = @transform_8, window_bounds = array<i64: 2, 1, 16>}, {pipeline_mode = #tpu.pipeline_mode<synchronous>, transform_indices = @transform_9, window_bounds = array<i64: 2, 32, 16>}, {pipeline_mode = #tpu.pipeline_mode<synchronous>, transform_indices = @transform_10, window_bounds = array<i64: 2, 1, 16>}, {transform_indices = @transform_11, window_bounds = array<i64: 16, 32>}]} {
    %c0 = arith.constant 0 : index
    %c0_0 = arith.constant 0 : index
    %0 = vector.load %arg1[%c0, %c0_0] : memref<16x32xf32, #tpu.memory_space<vmem>>, vector<16x32xf32>
    %1 = vector.extract_strided_slice %0 {offsets = [0, 0], sizes = [16, 16], strides = [1, 1]} : vector<16x32xf32> to vector<16x16xf32>
    %2 = vector.extract_strided_slice %0 {offsets = [0, 16], sizes = [16, 16], strides = [1, 1]} : vector<16x32xf32> to vector<16x16xf32>
    %c0_1 = arith.constant 0 : index
    %c0_2 = arith.constant 0 : index
    %c0_3 = arith.constant 0 : index
    %3 = vector.load %arg2[%c0_1, %c0_2, %c0_3] : memref<2x16x32xf32, #tpu.memory_space<vmem>>, vector<1x16x32xf32>
    %4 = vector.shape_cast %3 : vector<1x16x32xf32> to vector<16x32xf32>
    %cst = arith.constant dense<0.000000e+00> : vector<16x32xf32>
    %5 = tpu.matmul %2, %4, %cst {dimension_numbers = #tpu.dot_dimension_numbers<[1], [0], [0], [1], [0, 0, 1, 1], [], []>} : vector<16x16xf32>, vector<16x32xf32>, vector<16x32xf32> -> vector<16x32xf32>
    %c0_4 = arith.constant 0 : index
    %c0_5 = arith.constant 0 : index
    %c0_6 = arith.constant 0 : index
    %6 = vector.load %arg3[%c0_4, %c0_5, %c0_6] : memref<2x1x32xf32, #tpu.memory_space<vmem>>, vector<1x1x32xf32>
    %7 = vector.shape_cast %6 : vector<1x1x32xf32> to vector<1x32xf32>
    %8 = vector.broadcast %7 : vector<1x32xf32> to vector<16x32xf32>
    %9 = arith.addf %5, %8 : vector<16x32xf32>
    %cst_7 = arith.constant 0.000000e+00 : f32
    %10 = vector.broadcast %cst_7 : f32 to vector<16x32xf32>
    %11 = arith.maximumf %9, %10 : vector<16x32xf32>
    %c0_8 = arith.constant 0 : index
    %c0_9 = arith.constant 0 : index
    %c0_10 = arith.constant 0 : index
    %12 = vector.load %arg4[%c0_8, %c0_9, %c0_10] : memref<2x32x16xf32, #tpu.memory_space<vmem>>, vector<1x32x16xf32>
    %13 = vector.shape_cast %12 : vector<1x32x16xf32> to vector<32x16xf32>
    %cst_11 = arith.constant dense<0.000000e+00> : vector<16x16xf32>
    %14 = tpu.matmul %11, %13, %cst_11 {dimension_numbers = #tpu.dot_dimension_numbers<[1], [0], [0], [1], [0, 0, 1, 1], [], []>} : vector<16x32xf32>, vector<32x16xf32>, vector<16x16xf32> -> vector<16x16xf32>
    %c0_12 = arith.constant 0 : index
    %c0_13 = arith.constant 0 : index
    %c0_14 = arith.constant 0 : index
    %15 = vector.load %arg5[%c0_12, %c0_13, %c0_14] : memref<2x1x16xf32, #tpu.memory_space<vmem>>, vector<1x1x16xf32>
    %16 = vector.shape_cast %15 : vector<1x1x16xf32> to vector<1x16xf32>
    %17 = vector.broadcast %16 : vector<1x16xf32> to vector<16x16xf32>
    %18 = arith.addf %14, %17 : vector<16x16xf32>
    %19 = arith.addf %1, %18 : vector<16x16xf32>
    %c0_15 = arith.constant 0 : index
    %c0_16 = arith.constant 0 : index
    %c0_17 = arith.constant 0 : index
    %20 = vector.load %arg6[%c0_15, %c0_16, %c0_17] : memref<2x16x64xf32, #tpu.memory_space<vmem>>, vector<1x16x64xf32>
    %21 = vector.shape_cast %20 : vector<1x16x64xf32> to vector<16x64xf32>
    %cst_18 = arith.constant dense<0.000000e+00> : vector<16x64xf32>
    %22 = tpu.matmul %19, %21, %cst_18 {dimension_numbers = #tpu.dot_dimension_numbers<[1], [0], [0], [1], [0, 0, 1, 1], [], []>} : vector<16x16xf32>, vector<16x64xf32>, vector<16x64xf32> -> vector<16x64xf32>
    %c0_19 = arith.constant 0 : index
    %c0_20 = arith.constant 0 : index
    %c0_21 = arith.constant 0 : index
    %23 = vector.load %arg7[%c0_19, %c0_20, %c0_21] : memref<2x1x64xf32, #tpu.memory_space<vmem>>, vector<1x1x64xf32>
    %24 = vector.shape_cast %23 : vector<1x1x64xf32> to vector<1x64xf32>
    %25 = vector.broadcast %24 : vector<1x64xf32> to vector<16x64xf32>
    %26 = arith.addf %22, %25 : vector<16x64xf32>
    %cst_22 = arith.constant 0.000000e+00 : f32
    %27 = vector.broadcast %cst_22 : f32 to vector<16x64xf32>
    %28 = arith.maximumf %26, %27 : vector<16x64xf32>
    %29 = vector.extract_strided_slice %28 {offsets = [0, 0], sizes = [16, 32], strides = [1, 1]} : vector<16x64xf32> to vector<16x32xf32>
    %c0_23 = arith.constant 0 : index
    %c0_24 = arith.constant 0 : index
    %c0_25 = arith.constant 0 : index
    %30 = vector.load %arg8[%c0_23, %c0_24, %c0_25] : memref<2x32x16xf32, #tpu.memory_space<vmem>>, vector<1x32x16xf32>
    %31 = vector.shape_cast %30 : vector<1x32x16xf32> to vector<32x16xf32>
    %cst_26 = arith.constant dense<0.000000e+00> : vector<16x16xf32>
    %32 = tpu.matmul %29, %31, %cst_26 {dimension_numbers = #tpu.dot_dimension_numbers<[1], [0], [0], [1], [0, 0, 1, 1], [], []>} : vector<16x32xf32>, vector<32x16xf32>, vector<16x16xf32> -> vector<16x16xf32>
    %c0_27 = arith.constant 0 : index
    %c0_28 = arith.constant 0 : index
    %c0_29 = arith.constant 0 : index
    %33 = vector.load %arg9[%c0_27, %c0_28, %c0_29] : memref<2x1x16xf32, #tpu.memory_space<vmem>>, vector<1x1x16xf32>
    %34 = vector.shape_cast %33 : vector<1x1x16xf32> to vector<1x16xf32>
    %35 = vector.broadcast %34 : vector<1x16xf32> to vector<16x16xf32>
    %36 = arith.addf %32, %35 : vector<16x16xf32>
    %37 = vector.extract_strided_slice %28 {offsets = [0, 32], sizes = [16, 32], strides = [1, 1]} : vector<16x64xf32> to vector<16x32xf32>
    %c0_30 = arith.constant 0 : index
    %c0_31 = arith.constant 0 : index
    %c0_32 = arith.constant 0 : index
    %38 = vector.load %arg10[%c0_30, %c0_31, %c0_32] : memref<2x32x16xf32, #tpu.memory_space<vmem>>, vector<1x32x16xf32>
    %39 = vector.shape_cast %38 : vector<1x32x16xf32> to vector<32x16xf32>
    %cst_33 = arith.constant dense<0.000000e+00> : vector<16x16xf32>
    %40 = tpu.matmul %37, %39, %cst_33 {dimension_numbers = #tpu.dot_dimension_numbers<[1], [0], [0], [1], [0, 0, 1, 1], [], []>} : vector<16x32xf32>, vector<32x16xf32>, vector<16x16xf32> -> vector<16x16xf32>
    %c0_34 = arith.constant 0 : index
    %c0_35 = arith.constant 0 : index
    %c0_36 = arith.constant 0 : index
    %41 = vector.load %arg11[%c0_34, %c0_35, %c0_36] : memref<2x1x16xf32, #tpu.memory_space<vmem>>, vector<1x1x16xf32>
    %42 = vector.shape_cast %41 : vector<1x1x16xf32> to vector<1x16xf32>
    %43 = vector.broadcast %42 : vector<1x16xf32> to vector<16x16xf32>
    %44 = arith.addf %40, %43 : vector<16x16xf32>
    %45 = arith.negf %36 : vector<16x16xf32>
    %46 = math.exp %45 : vector<16x16xf32>
    %cst_37 = arith.constant 1.000000e+00 : f32
    %47 = vector.broadcast %cst_37 : f32 to vector<16x16xf32>
    %48 = arith.addf %47, %46 : vector<16x16xf32>
    %49 = arith.divf %47, %48 : vector<16x16xf32>
    %cst_38 = arith.constant 5.000000e-01 : f32
    %50 = vector.broadcast %cst_38 : f32 to vector<16x16xf32>
    %51 = arith.subf %49, %50 : vector<16x16xf32>
    %cst_39 = arith.constant 4.000000e-01 : f32
    %52 = vector.broadcast %cst_39 : f32 to vector<16x16xf32>
    %53 = arith.mulf %52, %51 : vector<16x16xf32>
    %54 = math.exp %53 : vector<16x16xf32>
    %55 = arith.mulf %54, %2 : vector<16x16xf32>
    %56 = arith.addf %55, %44 : vector<16x16xf32>
    %c1 = arith.constant 1 : index
    %c0_40 = arith.constant 0 : index
    %c0_41 = arith.constant 0 : index
    %57 = vector.load %arg2[%c1, %c0_40, %c0_41] : memref<2x16x32xf32, #tpu.memory_space<vmem>>, vector<1x16x32xf32>
    %58 = vector.shape_cast %57 : vector<1x16x32xf32> to vector<16x32xf32>
    %cst_42 = arith.constant dense<0.000000e+00> : vector<16x32xf32>
    %59 = tpu.matmul %56, %58, %cst_42 {dimension_numbers = #tpu.dot_dimension_numbers<[1], [0], [0], [1], [0, 0, 1, 1], [], []>} : vector<16x16xf32>, vector<16x32xf32>, vector<16x32xf32> -> vector<16x32xf32>
    %c1_43 = arith.constant 1 : index
    %c0_44 = arith.constant 0 : index
    %c0_45 = arith.constant 0 : index
    %60 = vector.load %arg3[%c1_43, %c0_44, %c0_45] : memref<2x1x32xf32, #tpu.memory_space<vmem>>, vector<1x1x32xf32>
    %61 = vector.shape_cast %60 : vector<1x1x32xf32> to vector<1x32xf32>
    %62 = vector.broadcast %61 : vector<1x32xf32> to vector<16x32xf32>
    %63 = arith.addf %59, %62 : vector<16x32xf32>
    %cst_46 = arith.constant 0.000000e+00 : f32
    %64 = vector.broadcast %cst_46 : f32 to vector<16x32xf32>
    %65 = arith.maximumf %63, %64 : vector<16x32xf32>
    %c1_47 = arith.constant 1 : index
    %c0_48 = arith.constant 0 : index
    %c0_49 = arith.constant 0 : index
    %66 = vector.load %arg4[%c1_47, %c0_48, %c0_49] : memref<2x32x16xf32, #tpu.memory_space<vmem>>, vector<1x32x16xf32>
    %67 = vector.shape_cast %66 : vector<1x32x16xf32> to vector<32x16xf32>
    %cst_50 = arith.constant dense<0.000000e+00> : vector<16x16xf32>
    %68 = tpu.matmul %65, %67, %cst_50 {dimension_numbers = #tpu.dot_dimension_numbers<[1], [0], [0], [1], [0, 0, 1, 1], [], []>} : vector<16x32xf32>, vector<32x16xf32>, vector<16x16xf32> -> vector<16x16xf32>
    %c1_51 = arith.constant 1 : index
    %c0_52 = arith.constant 0 : index
    %c0_53 = arith.constant 0 : index
    %69 = vector.load %arg5[%c1_51, %c0_52, %c0_53] : memref<2x1x16xf32, #tpu.memory_space<vmem>>, vector<1x1x16xf32>
    %70 = vector.shape_cast %69 : vector<1x1x16xf32> to vector<1x16xf32>
    %71 = vector.broadcast %70 : vector<1x16xf32> to vector<16x16xf32>
    %72 = arith.addf %68, %71 : vector<16x16xf32>
    %73 = arith.addf %19, %72 : vector<16x16xf32>
    %c1_54 = arith.constant 1 : index
    %c0_55 = arith.constant 0 : index
    %c0_56 = arith.constant 0 : index
    %74 = vector.load %arg6[%c1_54, %c0_55, %c0_56] : memref<2x16x64xf32, #tpu.memory_space<vmem>>, vector<1x16x64xf32>
    %75 = vector.shape_cast %74 : vector<1x16x64xf32> to vector<16x64xf32>
    %cst_57 = arith.constant dense<0.000000e+00> : vector<16x64xf32>
    %76 = tpu.matmul %73, %75, %cst_57 {dimension_numbers = #tpu.dot_dimension_numbers<[1], [0], [0], [1], [0, 0, 1, 1], [], []>} : vector<16x16xf32>, vector<16x64xf32>, vector<16x64xf32> -> vector<16x64xf32>
    %c1_58 = arith.constant 1 : index
    %c0_59 = arith.constant 0 : index
    %c0_60 = arith.constant 0 : index
    %77 = vector.load %arg7[%c1_58, %c0_59, %c0_60] : memref<2x1x64xf32, #tpu.memory_space<vmem>>, vector<1x1x64xf32>
    %78 = vector.shape_cast %77 : vector<1x1x64xf32> to vector<1x64xf32>
    %79 = vector.broadcast %78 : vector<1x64xf32> to vector<16x64xf32>
    %80 = arith.addf %76, %79 : vector<16x64xf32>
    %cst_61 = arith.constant 0.000000e+00 : f32
    %81 = vector.broadcast %cst_61 : f32 to vector<16x64xf32>
    %82 = arith.maximumf %80, %81 : vector<16x64xf32>
    %83 = vector.extract_strided_slice %82 {offsets = [0, 0], sizes = [16, 32], strides = [1, 1]} : vector<16x64xf32> to vector<16x32xf32>
    %c1_62 = arith.constant 1 : index
    %c0_63 = arith.constant 0 : index
    %c0_64 = arith.constant 0 : index
    %84 = vector.load %arg8[%c1_62, %c0_63, %c0_64] : memref<2x32x16xf32, #tpu.memory_space<vmem>>, vector<1x32x16xf32>
    %85 = vector.shape_cast %84 : vector<1x32x16xf32> to vector<32x16xf32>
    %cst_65 = arith.constant dense<0.000000e+00> : vector<16x16xf32>
    %86 = tpu.matmul %83, %85, %cst_65 {dimension_numbers = #tpu.dot_dimension_numbers<[1], [0], [0], [1], [0, 0, 1, 1], [], []>} : vector<16x32xf32>, vector<32x16xf32>, vector<16x16xf32> -> vector<16x16xf32>
    %c1_66 = arith.constant 1 : index
    %c0_67 = arith.constant 0 : index
    %c0_68 = arith.constant 0 : index
    %87 = vector.load %arg9[%c1_66, %c0_67, %c0_68] : memref<2x1x16xf32, #tpu.memory_space<vmem>>, vector<1x1x16xf32>
    %88 = vector.shape_cast %87 : vector<1x1x16xf32> to vector<1x16xf32>
    %89 = vector.broadcast %88 : vector<1x16xf32> to vector<16x16xf32>
    %90 = arith.addf %86, %89 : vector<16x16xf32>
    %91 = vector.extract_strided_slice %82 {offsets = [0, 32], sizes = [16, 32], strides = [1, 1]} : vector<16x64xf32> to vector<16x32xf32>
    %c1_69 = arith.constant 1 : index
    %c0_70 = arith.constant 0 : index
    %c0_71 = arith.constant 0 : index
    %92 = vector.load %arg10[%c1_69, %c0_70, %c0_71] : memref<2x32x16xf32, #tpu.memory_space<vmem>>, vector<1x32x16xf32>
    %93 = vector.shape_cast %92 : vector<1x32x16xf32> to vector<32x16xf32>
    %cst_72 = arith.constant dense<0.000000e+00> : vector<16x16xf32>
    %94 = tpu.matmul %91, %93, %cst_72 {dimension_numbers = #tpu.dot_dimension_numbers<[1], [0], [0], [1], [0, 0, 1, 1], [], []>} : vector<16x32xf32>, vector<32x16xf32>, vector<16x16xf32> -> vector<16x16xf32>
    %c1_73 = arith.constant 1 : index
    %c0_74 = arith.constant 0 : index
    %c0_75 = arith.constant 0 : index
    %95 = vector.load %arg11[%c1_73, %c0_74, %c0_75] : memref<2x1x16xf32, #tpu.memory_space<vmem>>, vector<1x1x16xf32>
    %96 = vector.shape_cast %95 : vector<1x1x16xf32> to vector<1x16xf32>
    %97 = vector.broadcast %96 : vector<1x16xf32> to vector<16x16xf32>
    %98 = arith.addf %94, %97 : vector<16x16xf32>
    %99 = arith.negf %90 : vector<16x16xf32>
    %100 = math.exp %99 : vector<16x16xf32>
    %cst_76 = arith.constant 1.000000e+00 : f32
    %101 = vector.broadcast %cst_76 : f32 to vector<16x16xf32>
    %102 = arith.addf %101, %100 : vector<16x16xf32>
    %103 = arith.divf %101, %102 : vector<16x16xf32>
    %cst_77 = arith.constant 5.000000e-01 : f32
    %104 = vector.broadcast %cst_77 : f32 to vector<16x16xf32>
    %105 = arith.subf %103, %104 : vector<16x16xf32>
    %cst_78 = arith.constant 4.000000e-01 : f32
    %106 = vector.broadcast %cst_78 : f32 to vector<16x16xf32>
    %107 = arith.mulf %106, %105 : vector<16x16xf32>
    %108 = math.exp %107 : vector<16x16xf32>
    %109 = arith.mulf %108, %56 : vector<16x16xf32>
    %110 = arith.addf %109, %98 : vector<16x16xf32>
    %111 = tpu.concatenate %73, %110 in 1 : vector<16x16xf32>, vector<16x16xf32> -> vector<16x32xf32>
    %c0_79 = arith.constant 0 : index
    %c0_80 = arith.constant 0 : index
    %112 = vector.load %arg12[%c0_79, %c0_80] : memref<16x32xf32, #tpu.memory_space<vmem>>, vector<16x32xf32>
    tpu.vector_store %arg12[%c0_79, %c0_80], %111 {strides = array<i32>} : memref<16x32xf32, #tpu.memory_space<vmem>>, vector<16x32xf32>,
    return
  }
  func.func @transform_0(%arg0: i32) -> (i32, i32) {
    %c0_i32 = arith.constant 0 : i32
    %c0_i32_0 = arith.constant 0 : i32
    return %arg0, %c0_i32 : i32, i32
  }
  func.func @transform_1(%arg0: i32) -> (i32, i32, i32) {
    %c0_i32 = arith.constant 0 : i32
    %c0_i32_0 = arith.constant 0 : i32
    %c0_i32_1 = arith.constant 0 : i32
    %c0_i32_2 = arith.constant 0 : i32
    return %c0_i32, %c0_i32_0, %c0_i32_1 : i32, i32, i32
  }
  func.func @transform_2(%arg0: i32) -> (i32, i32, i32) {
    %c0_i32 = arith.constant 0 : i32
    %c0_i32_0 = arith.constant 0 : i32
    %c0_i32_1 = arith.constant 0 : i32
    %c0_i32_2 = arith.constant 0 : i32
    return %c0_i32, %c0_i32_0, %c0_i32_1 : i32, i32, i32
  }
  func.func @transform_3(%arg0: i32) -> (i32, i32, i32) {
    %c0_i32 = arith.constant 0 : i32
    %c0_i32_0 = arith.constant 0 : i32
    %c0_i32_1 = arith.constant 0 : i32
    %c0_i32_2 = arith.constant 0 : i32
    return %c0_i32, %c0_i32_0, %c0_i32_1 : i32, i32, i32
  }
  func.func @transform_4(%arg0: i32) -> (i32, i32, i32) {
    %c0_i32 = arith.constant 0 : i32
    %c0_i32_0 = arith.constant 0 : i32
    %c0_i32_1 = arith.constant 0 : i32
    %c0_i32_2 = arith.constant 0 : i32
    return %c0_i32, %c0_i32_0, %c0_i32_1 : i32, i32, i32
  }
  func.func @transform_5(%arg0: i32) -> (i32, i32, i32) {
    %c0_i32 = arith.constant 0 : i32
    %c0_i32_0 = arith.constant 0 : i32
    %c0_i32_1 = arith.constant 0 : i32
    %c0_i32_2 = arith.constant 0 : i32
    return %c0_i32, %c0_i32_0, %c0_i32_1 : i32, i32, i32
  }
  func.func @transform_6(%arg0: i32) -> (i32, i32, i32) {
    %c0_i32 = arith.constant 0 : i32
    %c0_i32_0 = arith.constant 0 : i32
    %c0_i32_1 = arith.constant 0 : i32
    %c0_i32_2 = arith.constant 0 : i32
    return %c0_i32, %c0_i32_0, %c0_i32_1 : i32, i32, i32
  }
  func.func @transform_7(%arg0: i32) -> (i32, i32, i32) {
    %c0_i32 = arith.constant 0 : i32
    %c0_i32_0 = arith.constant 0 : i32
    %c0_i32_1 = arith.constant 0 : i32
    %c0_i32_2 = arith.constant 0 : i32
    return %c0_i32, %c0_i32_0, %c0_i32_1 : i32, i32, i32
  }
  func.func @transform_8(%arg0: i32) -> (i32, i32, i32) {
    %c0_i32 = arith.constant 0 : i32
    %c0_i32_0 = arith.constant 0 : i32
    %c0_i32_1 = arith.constant 0 : i32
    %c0_i32_2 = arith.constant 0 : i32
    return %c0_i32, %c0_i32_0, %c0_i32_1 : i32, i32, i32
  }
  func.func @transform_9(%arg0: i32) -> (i32, i32, i32) {
    %c0_i32 = arith.constant 0 : i32
    %c0_i32_0 = arith.constant 0 : i32
    %c0_i32_1 = arith.constant 0 : i32
    %c0_i32_2 = arith.constant 0 : i32
    return %c0_i32, %c0_i32_0, %c0_i32_1 : i32, i32, i32
  }
  func.func @transform_10(%arg0: i32) -> (i32, i32, i32) {
    %c0_i32 = arith.constant 0 : i32
    %c0_i32_0 = arith.constant 0 : i32
    %c0_i32_1 = arith.constant 0 : i32
    %c0_i32_2 = arith.constant 0 : i32
    return %c0_i32, %c0_i32_0, %c0_i32_1 : i32, i32, i32
  }
  func.func @transform_11(%arg0: i32) -> (i32, i32) {
    %c0_i32 = arith.constant 0 : i32
    %c0_i32_0 = arith.constant 0 : i32
    return %arg0, %c0_i32 : i32, i32
  }
}

</mosaic_0001>

<bundles_post_ra>
// kernel: tpu_custom_call.1
= control target key start
LH: loop header
LB: loop body
LE: loop exit
PB: predicated region body
PF: predicated region fallthrough
CT: control target
= control target key end

     0   :  { %s686_s21 = smov 112   ;;  %s947_s0 = inlined_call_operand.vmem [shape: f32[16,32], index: 0, kind: input, shape index: {}]   ;;  %s948_s1 = inlined_call_operand.vmem [shape: f32[2,16,32], index: 1, kind: input, shape index: {}]   ;;  %s949_s2 = inlined_call_operand.vmem [shape: f32[2,1,32], index: 2, kind: input, shape index: {}]   ;;  %s950_s3 = inlined_call_operand.vmem [shape: f32[2,32,16], index: 3, kind: input, shape index: {}]   ;;  %s951_s4 = inlined_call_operand.vmem [shape: f32[2,1,16], index: 4, kind: input, shape index: {}]   ;;  %s952_s5 = inlined_call_operand.vmem [shape: f32[2,16,64], index: 5, kind: input, shape index: {}]   ;;  %s953_s6 = inlined_call_operand.vmem [shape: f32[2,1,64], index: 6, kind: input, shape index: {}]   ;;  %s954_s7 = inlined_call_operand.vmem [shape: f32[2,32,16], index: 7, kind: input, shape index: {}]   ;;  %s955_s8 = inlined_call_operand.vmem [shape: f32[2,1,16], index: 8, kind: input, shape index: {}]   ;;  %s956_s9 = inlined_call_operand.vmem [shape: f32[2,32,16], index: 9, kind: input, shape index: {}]   ;;  %s957_s10 = inlined_call_operand.vmem [shape: f32[2,1,16], index: 10, kind: input, shape index: {}]   ;;  %s958_s11 = inlined_call_operand.hbm [shape: f32[16,32], index: 11, kind: output, shape index: {}]  }
   0x1   :  { %v39_v0 = vld [vmem:[%s947_s0] sm:$0xff]  ;;  %v42_v1 = vld [vmem:[%s948_s1 + $0x8] sm:$0xff] }
   0x2   :  { %49 = vrot.lane.b32.xlu0 %v39_v0, %s686_s21  ;;  %72 = vmatpush.msra.mxu0 %v42_v1  ;;  %v41_v2 = vld [vmem:[%s948_s1] sm:$0xff] }
   0x3   :  { %616 = vmatpush.msra.mxu1 %v42_v1 }
   0x4   :  { %73 = vmatpush.msra.mxu0 %v41_v2 }
   0x5   :  { %617 = vmatpush.msra.mxu1 %v41_v2 }
   0x6   :  { %16 = vsyncpa [#allocation3], 0  ;;  %v40_v3 = vld [vmem:[%s947_s0 + $0x8] sm:$0xff]  ;;  %v86_v4 = vld [vmem:[%s950_s3 + $0x18] sm:$0xff]  ;;  %vm53_vm0 = vcmask 130048   ;;  %vm91_vm1 = vcmask 261120  }
   0x7   :  { %v85_v5 = vld [vmem:[%s950_s3 + $0x10] sm:$0xff]  ;;  %110 = vmatpush.msrb.mxu1 %v86_v4  ;;  %v84_v8 = vld [vmem:[%s950_s3 + $0x8] sm:$0xff]  ;;  %v83_v9 = vld [vmem:[%s950_s3] sm:$0xff]  ;;  %s687_s20 = smov 96   ;;  %s688_s17 = smov 16  }
   0x8   :  { %v626_v10 = vld [vmem:[%s949_s2] ss:$0 sm:$0xff]  ;;  %v124_v17 = vld [vmem:[%s952_s5 + $0x8] sm:$0xff]  ;;  %v163_v19 = vld [vmem:[%s954_s7 + $0x18] sm:$0xff]  ;;  %s555_s22 = sshll.u32 %s958_s11, 4  ;;  %s691_s23 = smov 8   ;;  %s556_s22 = int_to_ptr.hbm [resolvable:$true] %s555_s22 }
   0x9   :  { %111 = vmatpush.msrb.mxu1 %v85_v5  ;;  %149 = vmatpush.msra.mxu2 %v124_v17  ;;  %v123_v18 = vld [vmem:[%s952_s5] sm:$0xff]  ;;  %v162_v27 = vld [vmem:[%s954_s7 + $0x10] sm:$0xff]  ;;  %v161_v28 = vld [vmem:[%s954_s7 + $0x8] sm:$0xff] }
   0xa   :  { %51 = vrot.lane.b32.xlu0 %v40_v3, %s686_s21  ;;  %618 = vmatpush.msra.mxu3 %v124_v17  ;;  %v627_v20 = vld [vmem:[%s951_s4] ss:$0 sm:$0xff]  ;;  %v200_v30 = vld [vmem:[%s956_s9 + $0x18] sm:$0xff]  ;;  %v199_v31 = vld [vmem:[%s956_s9 + $0x10] sm:$0xff] }
   0xb   :  { %112 = vmatpush.msrb.mxu1 %v84_v8  ;;  %150 = vmatpush.msra.mxu2 %v123_v18  ;;  %v160_v29 = vld [vmem:[%s954_s7] sm:$0xff]  ;;  %v198_v32 = vld [vmem:[%s956_s9 + $0x8] sm:$0xff]  ;;  %v582_v43 = vld [vmem:[%s948_s1 + $0x18] sm:$0xff] }
   0xc   :  { %619 = vmatpush.msra.mxu3 %v123_v18  ;;  %225 = vmatpush.msrb.mxu0 %v200_v30  ;;  %v197_v33 = vld [vmem:[%s956_s9] sm:$0xff] }
   0xd   :  { %113 = vmatpush.msrb.mxu1 %v83_v9  ;;  %v628_v34 = vld [vmem:[%s953_s6] ss:$0 sm:$0xff]  ;;  %316 = vmatpush.msrb.mxu2 %v582_v43 }
   0xe   :  { %186 = vmatpush.msrb.mxu3 %v163_v19  ;;  %226 = vmatpush.msrb.mxu0 %v199_v31  ;;  %v629_v45 = vld [vmem:[%s955_s8] ss:$0 sm:$0xff] }
  0x10   :  { %187 = vmatpush.msrb.mxu3 %v162_v27  ;;  %227 = vmatpush.msrb.mxu0 %v198_v32 }
  0x12   :  { %188 = vmatpush.msrb.mxu3 %v161_v28  ;;  %228 = vmatpush.msrb.mxu0 %v197_v33 }
  0x14   :  { %189 = vmatpush.msrb.mxu3 %v160_v29 }
  0x74   :  { %v770_v6 = vpop.permute.xlu0 %49 }
  0x75   :  { %567 = vmatmul.msk.f32.vlgmr.msra.gmra.mxu0 %vm53_vm0, %v770_v6 }
  0x7c   :  { %v774_v7 = vpop.permute.xlu0 %51 }
  0x7d   :  { %568 = vmatmul.msk.f32.vlgmr.msra.gmra.mxu1 %vm53_vm0, %v774_v7 }
  0xf2   :  { %v75_v11 = vpop.f32.mrf.mxu0 }
  0xf3   :  { %v76_v12 = vadd.f32 %v626_v10, %v75_v11 }
  0xf5   :  { %v81_v13 = vmax.f32 %v76_v12, 0.0  ;;  %v589_v12 = vld [vmem:[%s950_s3 + $0x38] sm:$0xff] }
  0xf6   :  { %355 = vmatpush.msra.mxu1 %v589_v12 }
  0xf7   :  { %569 = vmatmul.msk.f32.vlgmr.msrb.gmra.mxu1 %vm91_vm1, %v81_v13  ;;  %v588_v13 = vld [vmem:[%s950_s3 + $0x30] sm:$0xff] }
  0xf8   :  { %356 = vmatpush.msra.mxu1 %v588_v13 }
  0xfa   :  { %v78_v14 = vpop.f32.mrf.mxu1 }
  0xfb   :  { %v79_v15 = vadd.f32 %v626_v10, %v78_v14 }
  0xfd   :  { %v82_v16 = vmax.f32 %v79_v15, 0.0 }
  0xff   :  { %570 = vmatmul.msk.f32.gmra.mxu1 %vm91_vm1, %v82_v16  ;;  %v587_v16 = vld [vmem:[%s950_s3 + $0x28] sm:$0xff] }
 0x100   :  { %357 = vmatpush.msra.mxu1 %v587_v16 }
 0x174   :  { %v115_v21 = vpop.f32.mrf.mxu1 }
 0x175   :  { %v116_v22 = vadd.f32 %v627_v20, %v115_v21 }
 0x177   :  { %v801_v23 = vadd.f32 %v116_v22, %v39_v0  ;;  %v581_v0 = vld [vmem:[%s948_s1 + $0x10] sm:$0xff] }
 0x178   :  { %317 = vmatpush.msrb.mxu2 %v581_v0 }
 0x179   :  { %571 = vmatmul.msk.f32.vlgmr.msra.gmra.mxu2 %vm53_vm0, %v801_v23 }
 0x17c   :  { %v118_v24 = vpop.f32.mrf.mxu1 }
 0x17d   :  { %v119_v25 = vadd.f32 %v627_v20, %v118_v24  ;;  %v630_v24 = vld [vmem:[%s957_s10] ss:$0 sm:$0xff] }
 0x17f   :  { %v805_v26 = vadd.f32 %v119_v25, %v40_v3 }
 0x181   :  { %572 = vmatmul.msk.f32.vlgmr.msra.gmra.mxu3 %vm53_vm0, %v805_v26 }
 0x1fc   :  { %v152_v35 = vpop.f32.mrf.mxu2 }
 0x1fd   :  { %v153_v36 = vadd.f32 %v628_v34, %v152_v35 }
 0x1ff   :  { %v158_v37 = vmax.f32 %v153_v36, 0.0  ;;  %v586_v36 = vld [vmem:[%s950_s3 + $0x20] sm:$0xff]  ;;  %s690_s3 = smov 128  }
 0x200   :  { %358 = vmatpush.msra.mxu1 %v586_v36 }
 0x201   :  { %205 = vrot.lane.b32.xlu1 %v158_v37, %s687_s20  ;;  %573 = vmatmul.msk.f32.vlgmr.msrb.gmra.mxu3 %vm91_vm1, %v158_v37  ;;  %v593_v37 = vld [vmem:[%s952_s5 + $0x10] sm:$0xff] }
 0x204   :  { %v155_v38 = vpop.f32.mrf.mxu3 }
 0x205   :  { %v156_v39 = vadd.f32 %v628_v34, %v155_v38 }
 0x207   :  { %v159_v40 = vmax.f32 %v156_v39, 0.0 }
 0x209   :  { %207 = vrot.lane.b32.xlu1 %v159_v40, %s687_s20  ;;  %574 = vmatmul.msk.f32.gmra.mxu3 %vm91_vm1, %v159_v40 }
 0x273   :  { %v206_v41 = vpop.permute.xlu1 %205 }
 0x274   :  { %575 = vmatmul.msk.f32.vlgmr.msrb.gmra.mxu0 %vm91_vm1, %v206_v41 }
 0x27b   :  { %v208_v42 = vpop.permute.xlu1 %207 }
 0x27c   :  { %576 = vmatmul.msk.f32.gmra.mxu0 %vm91_vm1, %v208_v42 }
 0x284   :  { %v191_v44 = vpop.f32.mrf.mxu3 }
 0x285   :  { %v192_v46 = vadd.f32 %v629_v45, %v191_v44  ;;  %v601_v44 = vld [vmem:[%s954_s7 + $0x38] sm:$0xff] }
 0x286   :  { %435 = vmatpush.msra.mxu0 %v601_v44 }
 0x287   :  { %v577_v47 = vmul.f32 -1.442695, %v192_v46 }
 0x289   :  { %636 = vpow2.f32 %v577_v47 }
 0x28c   :  { %v194_v48 = vpop.f32.mrf.mxu3 }
 0x28d   :  { %v195_v49 = vadd.f32 %v629_v45, %v194_v48  ;;  %v632_v45 = vld [vmem:[%s951_s4 + $0x1] ss:$0 sm:$0xff] }
 0x28f   :  { %v578_v50 = vmul.f32 -1.442695, %v195_v49  ;;  %v637_v51 = vpop.eup %636 }
 0x290   :  { %v242_v52 = vadd.f32 1.0, %v637_v51 }
 0x291   :  { %638 = vpow2.f32 %v578_v50 }
 0x292   :  { %640 = vrcp.f32 %v242_v52  ;;  %v255_v63 = vand.u32 2147483648, %v242_v52  ;;  %vm249_vm3 = vweird.f32 %v242_v52  ;;  %v253_v1 = vand.u32 2147483647, %v242_v52 }
 0x294   :  { %v256_v4 = vor.u32 1.1754944e-38, %v255_v63  ;;  %vm254_vm5 = vcmp.eq.f32.partialorder %v253_v1, 8.507059e+37 }
 0x297   :  { %v639_v53 = vpop.eup %638 }
 0x298   :  { %v243_v54 = vadd.f32 1.0, %v639_v53  ;;  %v641_v55 = vpop.eup %640  ;;  %v598_v53 = vld [vmem:[%s954_s7 + $0x20] sm:$0xff] }
 0x299   :  { %v245_v56 = vmul.f32 %v641_v55, %v242_v52  ;;  %vm250_vm2 = vweird.f32 %v641_v55  ;;  %v600_v52 = vld [vmem:[%s954_s7 + $0x30] sm:$0xff] }
 0x29a   :  { %642 = vrcp.f32 %v243_v54  ;;  %vm251_vm4 = vmor %vm249_vm3, %vm250_vm2  ;;  %v270_v9 = vand.u32 2147483648, %v243_v54  ;;  %vm264_vm7 = vweird.f32 %v243_v54  ;;  %v268_v10 = vand.u32 2147483647, %v243_v54  ;;  %436 = vmatpush.msra.mxu0 %v600_v52 }
 0x29b   :  { %v246_v57 = vsub.f32 1.0, %v245_v56  ;;  %v605_v56 = vld [vmem:[%s956_s9 + $0x20] sm:$0xff] }
 0x29c   :  { %v271_v15 = vor.u32 1.1754944e-38, %v270_v9  ;;  %vm269_vm9 = vcmp.eq.f32.partialorder %v268_v10, 8.507059e+37 }
 0x29d   :  { %v247_v59 = vmul.f32 %v641_v55, %v246_v57  ;;  %v633_v57 = vld [vmem:[%s953_s6 + $0x1] ss:$0 sm:$0xff] }
 0x29f   :  { %v248_v62 = vadd.f32 %v641_v55, %v247_v59 }
 0x2a0   :  { %v643_v58 = vpop.eup %642 }
 0x2a1   :  { %v260_v60 = vmul.f32 %v643_v58, %v243_v54  ;;  %v252_v3 = vsel %vm251_vm4, %v641_v55, %v248_v62  ;;  %vm265_vm6 = vweird.f32 %v643_v58  ;;  %v607_v54 = vld [vmem:[%s956_s9 + $0x30] sm:$0xff]  ;;  %v606_v55 = vld [vmem:[%s956_s9 + $0x28] sm:$0xff] }
 0x2a2   :  { %v257_v5 = vsel %vm254_vm5, %v256_v4, %v252_v3  ;;  %vm266_vm8 = vmor %vm264_vm7, %vm265_vm6  ;;  %v634_v3 = vld [vmem:[%s955_s8 + $0x1] ss:$0 sm:$0xff] }
 0x2a3   :  { %v261_v61 = vsub.f32 1.0, %v260_v60  ;;  %v579_v11 = vadd.f32 -0.5, %v257_v5 }
 0x2a5   :  { %v262_v2 = vmul.f32 %v643_v58, %v261_v61  ;;  %v276_v17 = vmul.f32 0.4, %v579_v11 }
 0x2a7   :  { %v263_v8 = vadd.f32 %v643_v58, %v262_v2  ;;  %v278_v19 = vmul.f32 1.442695, %v276_v17 }
 0x2a9   :  { %v267_v14 = vsel %vm266_vm8, %v643_v58, %v263_v8  ;;  %644 = vpow2.f32 %v278_v19 }
 0x2aa   :  { %v272_v18 = vsel %vm269_vm9, %v271_v15, %v267_v14 }
 0x2ab   :  { %v580_v20 = vadd.f32 -0.5, %v272_v18 }
 0x2ad   :  { %v277_v21 = vmul.f32 0.4, %v580_v20 }
 0x2af   :  { %v280_v22 = vmul.f32 1.442695, %v277_v21  ;;  %v645_v25 = vpop.eup %644 }
 0x2b0   :  { %v284_v29 = vmul.f32 %v645_v25, %v770_v6  ;;  %v594_v6 = vld [vmem:[%s952_s5 + $0x18] sm:$0xff] }
 0x2b1   :  { %646 = vpow2.f32 %v280_v22  ;;  %396 = vmatpush.msra.mxu3 %v594_v6 }
 0x2b3   :  { %397 = vmatpush.msra.mxu3 %v593_v37 }
 0x2b7   :  { %v647_v31 = vpop.eup %646 }
 0x2b8   :  { %v285_v34 = vmul.f32 %v647_v31, %v774_v7  ;;  %v631_v7 = vld [vmem:[%s949_s2 + $0x1] ss:$0 sm:$0xff] }
 0x2f1   :  { %v230_v27 = vpop.f32.mrf.mxu0 }
 0x2f2   :  { %v231_v28 = vadd.f32 %v630_v24, %v230_v27 }
 0x2f4   :  { %v861_v30 = vadd.f32 %v284_v29, %v231_v28 }
 0x2f6   :  { %584 = vmatmul.msk.f32.vlgmr.msrb.gmra.mxu2 %vm53_vm0, %v861_v30 }
 0x2f9   :  { %v233_v32 = vpop.f32.mrf.mxu0 }
 0x2fa   :  { %v234_v33 = vadd.f32 %v630_v24, %v233_v32 }
 0x2fc   :  { %v866_v35 = vadd.f32 %v285_v34, %v234_v33 }
 0x2fe   :  { %585 = vmatmul.msk.f32.gmra.mxu2 %vm53_vm0, %v866_v35 }
 0x379   :  { %v319_v38 = vpop.f32.mrf.mxu2 }
 0x37a   :  { %v320_v39 = vadd.f32 %v631_v7, %v319_v38 }
 0x37c   :  { %v325_v40 = vmax.f32 %v320_v39, 0.0 }
 0x37e   :  { %591 = vmatmul.msk.f32.vlgmr.msra.gmra.mxu1 %vm91_vm1, %v325_v40 }
 0x381   :  { %v322_v41 = vpop.f32.mrf.mxu2 }
 0x382   :  { %v323_v42 = vadd.f32 %v631_v7, %v322_v41 }
 0x384   :  { %v326_v43 = vmax.f32 %v323_v42, 0.0 }
 0x386   :  { %592 = vmatmul.msk.f32.gmra.mxu1 %vm91_vm1, %v326_v43  ;;  %v635_v43 = vld [vmem:[%s957_s10 + $0x1] ss:$0 sm:$0xff]  ;;  %s689_s10 = smov [#allocation2]  }
 0x387   :  { %s553_s18 = sshll.u32 %s689_s10, 4  ;;  %s554_s18 = int_to_ptr.vmem [resolvable:$true] %s553_s18 }
 0x3fb   :  { %v360_v46 = vpop.f32.mrf.mxu1 }
 0x3fc   :  { %v361_v47 = vadd.f32 %v632_v45, %v360_v46 }
 0x3fe   :  { %v891_v48 = vadd.f32 %v361_v47, %v801_v23  ;;  %v599_v23 = vld [vmem:[%s954_s7 + $0x28] sm:$0xff] }
 0x3ff   :  { %437 = vmatpush.msra.mxu0 %v599_v23 }
 0x400   :  { %596 = vmatmul.msk.f32.vlgmr.msra.gmra.mxu3 %vm53_vm0, %v891_v48 }
 0x401   :  { %438 = vmatpush.msra.mxu0 %v598_v53 }
 0x403   :  { %v363_v49 = vpop.f32.mrf.mxu1 }
 0x404   :  { %v364_v50 = vadd.f32 %v632_v45, %v363_v49 }
 0x406   :  { %v896_v51 = vadd.f32 %v364_v50, %v805_v26  ;;  %v608_v26 = vld [vmem:[%s956_s9 + $0x38] sm:$0xff] }
 0x407   :  { %476 = vmatpush.msra.mxu2 %v608_v26 }
 0x408   :  { %597 = vmatmul.msk.f32.gmra.mxu3 %vm53_vm0, %v896_v51 }
 0x409   :  { %477 = vmatpush.msra.mxu2 %v607_v54 }
 0x40b   :  { %478 = vmatpush.msra.mxu2 %v606_v55 }
 0x40d   :  { %479 = vmatpush.msra.mxu2 %v605_v56 }
 0x483   :  { %v399_v58 = vpop.f32.mrf.mxu3 }
 0x484   :  { %v400_v59 = vadd.f32 %v633_v57, %v399_v58 }
 0x486   :  { %v405_v60 = vmax.f32 %v400_v59, 0.0 }
 0x488   :  { %456 = vrot.lane.b32.xlu2 %v405_v60, %s687_s20  ;;  %603 = vmatmul.msk.f32.vlgmr.msra.gmra.mxu0 %vm91_vm1, %v405_v60 }
 0x48b   :  { %v402_v61 = vpop.f32.mrf.mxu3 }
 0x48c   :  { %v403_v62 = vadd.f32 %v633_v57, %v402_v61 }
 0x48e   :  { %v406_v63 = vmax.f32 %v403_v62, 0.0 }
 0x490   :  { %458 = vrot.lane.b32.xlu2 %v406_v63, %s687_s20  ;;  %604 = vmatmul.msk.f32.gmra.mxu0 %vm91_vm1, %v406_v63 }
 0x4e2   :  { %v457_v0 = vpop.permute.xlu2 %456 }
 0x4e3   :  { %610 = vmatmul.msk.f32.vlgmr.msra.gmra.mxu2 %vm91_vm1, %v457_v0 }
 0x4ea   :  { %v459_v1 = vpop.permute.xlu2 %458 }
 0x4eb   :  { %611 = vmatmul.msk.f32.gmra.mxu2 %vm91_vm1, %v459_v1 }
 0x505   :  { %v440_v2 = vpop.f32.mrf.mxu0 }
 0x506   :  { %v441_v4 = vadd.f32 %v634_v3, %v440_v2 }
 0x508   :  { %v612_v5 = vmul.f32 -1.442695, %v441_v4 }
 0x50a   :  { %648 = vpow2.f32 %v612_v5 }
 0x50d   :  { %v443_v8 = vpop.f32.mrf.mxu0 }
 0x50e   :  { %v444_v9 = vadd.f32 %v634_v3, %v443_v8 }
 0x510   :  { %v613_v10 = vmul.f32 -1.442695, %v444_v9  ;;  %v649_v11 = vpop.eup %648 }
 0x511   :  { %v493_v12 = vadd.f32 1.0, %v649_v11 }
 0x512   :  { %650 = vpow2.f32 %v613_v10 }
 0x513   :  { %652 = vrcp.f32 %v493_v12  ;;  %v506_v24 = vand.u32 2147483648, %v493_v12  ;;  %vm500_vm11 = vweird.f32 %v493_v12  ;;  %v504_v25 = vand.u32 2147483647, %v493_v12 }
 0x515   :  { %v507_v29 = vor.u32 1.1754944e-38, %v506_v24  ;;  %vm505_vm13 = vcmp.eq.f32.partialorder %v504_v25, 8.507059e+37 }
 0x518   :  { %v651_v13 = vpop.eup %650 }
 0x519   :  { %v494_v14 = vadd.f32 1.0, %v651_v13  ;;  %v653_v15 = vpop.eup %652 }
 0x51a   :  { %v496_v16 = vmul.f32 %v653_v15, %v493_v12  ;;  %vm501_vm10 = vweird.f32 %v653_v15 }
 0x51b   :  { %654 = vrcp.f32 %v494_v14  ;;  %vm502_vm12 = vmor %vm500_vm11, %vm501_vm10  ;;  %v521_v33 = vand.u32 2147483648, %v494_v14  ;;  %vm515_vm15 = vweird.f32 %v494_v14  ;;  %v519_v34 = vand.u32 2147483647, %v494_v14 }
 0x51c   :  { %v497_v17 = vsub.f32 1.0, %v496_v16 }
 0x51d   :  { %v522_v37 = vor.u32 1.1754944e-38, %v521_v33  ;;  %vm520_vm3 = vcmp.eq.f32.partialorder %v519_v34, 8.507059e+37 }
 0x51e   :  { %v498_v19 = vmul.f32 %v653_v15, %v497_v17 }
 0x520   :  { %v499_v22 = vadd.f32 %v653_v15, %v498_v19 }
 0x521   :  { %v655_v18 = vpop.eup %654 }
 0x522   :  { %v511_v20 = vmul.f32 %v655_v18, %v494_v14  ;;  %v503_v28 = vsel %vm502_vm12, %v653_v15, %v499_v22  ;;  %vm516_vm14 = vweird.f32 %v655_v18 }
 0x523   :  { %v508_v31 = vsel %vm505_vm13, %v507_v29, %v503_v28  ;;  %vm517_vm2 = vmor %vm515_vm15, %vm516_vm14 }
 0x524   :  { %v512_v21 = vsub.f32 1.0, %v511_v20  ;;  %v614_v36 = vadd.f32 -0.5, %v508_v31 }
 0x526   :  { %v513_v27 = vmul.f32 %v655_v18, %v512_v21  ;;  %v527_v7 = vmul.f32 0.4, %v614_v36 }
 0x528   :  { %v514_v32 = vadd.f32 %v655_v18, %v513_v27  ;;  %v529_v39 = vmul.f32 1.442695, %v527_v7 }
 0x52a   :  { %v518_v6 = vsel %vm517_vm2, %v655_v18, %v514_v32  ;;  %656 = vpow2.f32 %v529_v39 }
 0x52b   :  { %v523_v38 = vsel %vm520_vm3, %v522_v37, %v518_v6 }
 0x52c   :  { %v615_v40 = vadd.f32 -0.5, %v523_v38 }
 0x52e   :  { %v528_v41 = vmul.f32 0.4, %v615_v40 }
 0x530   :  { %v531_v42 = vmul.f32 1.442695, %v528_v41  ;;  %v657_v44 = vpop.eup %656 }
 0x531   :  { %v533_v47 = vmul.f32 %v657_v44, %v861_v30 }
 0x532   :  { %658 = vpow2.f32 %v531_v42 }
 0x538   :  { %v659_v50 = vpop.eup %658 }
 0x539   :  { %v534_v53 = vmul.f32 %v659_v50, %v866_v35 }
 0x566   :  { %v481_v45 = vpop.f32.mrf.mxu2 }
 0x567   :  { %v482_v46 = vadd.f32 %v635_v43, %v481_v45 }
 0x569   :  { %v535_v49 = vadd.f32 %v533_v47, %v482_v46 }
 0x56b   :  { %539 = vrot.lane.b32.xlu0 %v535_v49, %s688_s17 }
 0x56e   :  { %v484_v52 = vpop.f32.mrf.mxu2 }
 0x56f   :  { %v485_v23 = vadd.f32 %v635_v43, %v484_v52 }
 0x571   :  { %v536_v26 = vadd.f32 %v534_v53, %v485_v23 }
 0x573   :  { %541 = vrot.lane.b32.xlu1 %v536_v26, %s688_s17 }
 0x5dd   :  { %v540_v54 = vpop.permute.xlu0 %539 }
 0x5de   :  { %v545_v55 = vsel %vm53_vm0, %v891_v48, %v540_v54 }
 0x5df   :  { %547 = vst.msk [vmem:[#allocation2] sm:$0xff] %vm91_vm1, %v545_v55 }
 0x5e5   :  { %v542_v30 = vpop.permute.xlu1 %541 }
 0x5e6   :  { %v546_v35 = vsel %vm53_vm0, %v896_v51, %v542_v30 }
 0x5e7   :  { %548 = vst.msk [vmem:[#allocation2 + $0x8] sm:$0xff] %vm91_vm1, %v546_v35 }
 0x5e8   :  { %561 = dma.vmem_to_hbm [thread:$0]  %s554_s18, 256, %s556_s22, [#allocation3], %s690_s3, %s690_s3, %s691_s23  }
 0x5e9   :  { %684 = dma.done.wait [#allocation3], 256  }
 0x5ea   :  { %685 = vsyncadd [#allocation3], 4294967040 }
 0x5eb   :  { %566 = vsyncpa [#allocation3], 1 }

</bundles_post_ra>
